<compile_context>
chip_gen: v6e
topology: v6e:2x2x1
jax: 0.10.0
libtpu: 0.0.40
codegen_flags: <defaults>
</compile_context>

<pallas_src>
import numpy as np
import jax
import jax.numpy as jnp
from jax import lax
from jax.experimental import pallas as pl
from jax.experimental.pallas import tpu as pltpu


def _gelu(x):
    # act_layer = GELU(approximate='tanh')  (see TODO above)
    return jax.nn.gelu(x, approximate=True)


def patch_merging_kernel(x_ref, w1_ref, b1_ref, a_ref, w2_ref, b2_ref,
                         w3_ref, b3_ref, o_ref):
    n_taps = w2_ref.shape[0]
    p_out = o_ref.shape[1]

    # ---- conv1 (1x1) + folded BN + act: one bf16 MXU matmul ---------------
    # x is (N, tb*dim), w1 is block-diagonal (tb*dim, tb*C); channels of all
    # packed batch elements come out lane-dense (tb*C = 128).
    h1 = jnp.dot(x_ref[0], w1_ref[...],
                 preferred_element_type=jnp.float32)        # (N, tb*C) f32
    h1 = _gelu(h1 + b1_ref[...])

    # ---- depthwise 3x3 stride-2 conv + folded BN + act --------------------
    # Single stacked gather matmul over all 9 taps, then per-tap scale + sum
    # on the VPU.  A is 0/1 -> exact in bf16.
    g = jnp.dot(a_ref[...], h1.astype(jnp.bfloat16),
                preferred_element_type=jnp.float32)         # (9*P_out, tb*C)
    g = g.reshape(n_taps, p_out, g.shape[-1])               # sublane-aligned
    h2 = jnp.sum(g * w2_ref[...], axis=0)                   # (P_out, tb*C)
    h2 = _gelu(h2 + b2_ref[...])

    # ---- conv3 (1x1) + folded BN ------------------------------------------
    out = jnp.dot(h2.astype(jnp.bfloat16), w3_ref[...],
                  preferred_element_type=jnp.float32) + b3_ref[...]
    o_ref[0] = out.astype(o_ref.dtype)


def patch_merging(x, params, *, tb=2):
    """x: (B, N, dim) tokens.  params: BN-folded weights (see __main__)."""
    B, N, dim = x.shape
    w1, b1 = params["w1"], params["b1"]      # (dim, C), (1, C)
    A = params["A"]                          # (9, P_out, N) 0/1 gather taps
    w2, b2 = params["w2"], params["b2"]      # (9, 1, C), (1, C)
    w3, b3 = params["w3"], params["b3"]      # (C, C), (1, C)
    C = w1.shape[1]
    n_taps, P_out, _ = A.shape
    assert B % tb == 0, (B, tb)
    G = B // tb
    TBC = tb * C

    # --- pack tb batch elements along the channel (lane) axis --------------
    xp = (x.reshape(G, tb, N, dim).transpose(0, 2, 1, 3)
           .reshape(G, N, tb * dim).astype(jnp.bfloat16))

    # block-diagonal weights: one matmul handles all packed batch elements
    w1p = jnp.kron(jnp.eye(tb, dtype=w1.dtype), w1).astype(jnp.bfloat16)
    w3p = jnp.kron(jnp.eye(tb, dtype=w3.dtype), w3).astype(jnp.bfloat16)
    b1p = jnp.tile(b1, (1, tb))              # (1, tb*C) f32
    b2p = jnp.tile(b2, (1, tb))
    b3p = jnp.tile(b3, (1, tb))
    w2p = jnp.tile(w2, (1, 1, tb))           # (9, 1, tb*C) f32
    a_st = A.reshape(n_taps * P_out, N).astype(jnp.bfloat16)

    out_p = pl.pallas_call(
        patch_merging_kernel,
        out_shape=jax.ShapeDtypeStruct((G, P_out, TBC), jnp.float32),
        grid_spec=pltpu.PrefetchScalarGridSpec(
            num_scalar_prefetch=0,
            grid=(G,),
            in_specs=[
                pl.BlockSpec((1, N, tb * dim), lambda g: (g, 0, 0)),   # x packed
                pl.BlockSpec((tb * dim, TBC), lambda g: (0, 0)),       # w1 blkdiag
                pl.BlockSpec((1, TBC), lambda g: (0, 0)),              # b1
                pl.BlockSpec((n_taps * P_out, N), lambda g: (0, 0)),   # A stacked
                pl.BlockSpec((n_taps, 1, TBC), lambda g: (0, 0, 0)),   # w2 (dw)
                pl.BlockSpec((1, TBC), lambda g: (0, 0)),              # b2
                pl.BlockSpec((TBC, TBC), lambda g: (0, 0)),            # w3 blkdiag
                pl.BlockSpec((1, TBC), lambda g: (0, 0)),              # b3
            ],
            out_specs=pl.BlockSpec((1, P_out, TBC), lambda g: (g, 0, 0)),
        ),
        compiler_params=pltpu.CompilerParams(
            dimension_semantics=("parallel",)),
    )(xp, w1p, b1p, a_st, w2p, b2p, w3p, b3p)

    # unpack the channel-packed batch elements
    out = (out_p.reshape(G, P_out, tb, C).transpose(0, 2, 1, 3)
                .reshape(B, P_out, C))
    return out.astype(x.dtype)


# --------------------------- pure-JAX reference -----------------------------
def torch_reference(x_tokens, raw, H, W, stride, eps=1e-5):
    B, N, dim = x_tokens.shape
    x = x_tokens.reshape(B, H, W, dim).transpose(0, 3, 1, 2)  # NCHW, like torch

    def conv_bn(y, w, bn, s, pad, groups):
        y = lax.conv_general_dilated(
            y, w, window_strides=(s, s),
            padding=((pad, pad), (pad, pad)),
            dimension_numbers=("NCHW", "OIHW", "NCHW"),
            feature_group_count=groups)
        g, b, m, v = bn
        sc = g / jnp.sqrt(v + eps)
        return y * sc[None, :, None, None] + (b - m * sc)[None, :, None, None]

    y = _gelu(conv_bn(x, raw["w1"], raw["bn1"], 1, 0, 1))
    y = _gelu(conv_bn(y, raw["w2"], raw["bn2"], stride, 1, raw["w2"].shape[0]))
    y = conv_bn(y, raw["w3"], raw["bn3"], 1, 0, 1)
    B2, C, Ho, Wo = y.shape
    return y.reshape(B2, C, Ho * Wo).transpose(0, 2, 1)


# --------------------------------- main --------------------------------------
if __name__ == "__main__":
    H = W = 8                 # input_resolution = 8
    dim, out_dim = 32, 64
    B = 4                     # B % tb == 0 with tb = 2 -> 2 parallel grid steps
    stride = 2                # out_dim not in {320, 448, 576} -> conv2 stride 2
    eps = 1e-5

    key = jax.random.PRNGKey(0)
    ks = jax.random.split(key, 8)
    x = jax.random.normal(ks[0], (B, H * W, dim), jnp.float32)

    # deterministic synthetic parameters (torch shapes)
    w1 = jax.random.normal(ks[1], (out_dim, dim, 1, 1), jnp.float32) * 0.1
    w2 = jax.random.normal(ks[2], (out_dim, 1, 3, 3), jnp.float32) * 0.1
    w3 = jax.random.normal(ks[3], (out_dim, out_dim, 1, 1), jnp.float32) * 0.1

    def bn_params(k, c):
        k1, k2, k3, k4 = jax.random.split(k, 4)
        gamma = jax.random.uniform(k1, (c,), jnp.float32, 0.5, 1.5)
        beta = jax.random.normal(k2, (c,), jnp.float32) * 0.1
        mean = jax.random.normal(k3, (c,), jnp.float32) * 0.1
        var = jax.random.uniform(k4, (c,), jnp.float32, 0.5, 1.5)
        return gamma, beta, mean, var

    bn1 = bn_params(ks[4], out_dim)
    bn2 = bn_params(ks[5], out_dim)
    bn3 = bn_params(ks[6], out_dim)

    # fold BatchNorm (inference) into conv weights/biases
    def fold_pointwise(w, bn):
        g, b, m, v = bn
        s = g / jnp.sqrt(v + eps)
        wmat = w[:, :, 0, 0].T * s[None, :]          # (in, out)
        bias = (b - m * s)[None, :]                  # (1, out)
        return wmat, bias

    w1f, b1f = fold_pointwise(w1, bn1)
    w3f, b3f = fold_pointwise(w3, bn3)
    g2, bb2, m2, v2 = bn2
    s2 = g2 / jnp.sqrt(v2 + eps)
    w2f = jnp.stack([w2[:, 0, kh, kw] * s2
                     for kh in range(3) for kw in range(3)], axis=0)      # (9, C)
    w2f = w2f[:, None, :]                                                 # (9, 1, C)
    b2f = (bb2 - m2 * s2)[None, :]                                        # (1, C)

    # per-tap 0/1 gather matrices for the stride-2, pad-1 depthwise conv
    Ho = (H + 2 - 3) // stride + 1
    Wo = (W + 2 - 3) // stride + 1
    A = np.zeros((9, Ho * Wo, H * W), np.float32)
    for kh in range(3):
        for kw in range(3):
            t = kh * 3 + kw
            for ho in range(Ho):
                for wo in range(Wo):
                    hi = stride * ho + kh - 1
                    wi = stride * wo + kw - 1
                    if 0 <= hi < H and 0 <= wi < W:
                        A[t, ho * Wo + wo, hi * W + wi] = 1.0
    A = jnp.asarray(A)

    params = dict(w1=w1f, b1=b1f, A=A, w2=w2f, b2=b2f, w3=w3f, b3=b3f)

    out = patch_merging(x, params, tb=2)
    out = jax.block_until_ready(out)

    ref = torch_reference(
        x, dict(w1=w1, bn1=bn1, w2=w2, bn2=bn2, w3=w3, bn3=bn3), H, W, stride)

    assert out.shape == (B, Ho * Wo, out_dim), out.shape
    # bf16 MXU operands (f32 accumulation) -> tolerance appropriate for bf16
    max_err = float(jnp.max(jnp.abs(out - ref)))
    assert jnp.allclose(out, ref, atol=5e-2, rtol=5e-2), max_err
    print("KERNEL_OK")
</pallas_src>

<mosaic_0001>
module attributes {stable_mosaic.version = 11 : i64} {
  func.func @patch_merging_kernel(%arg0: i32, %arg1: memref<1x64x64xbf16, #tpu.memory_space<vmem>>, %arg2: memref<64x128xbf16, #tpu.memory_space<vmem>>, %arg3: memref<1x128xf32, #tpu.memory_space<vmem>>, %arg4: memref<144x64xbf16, #tpu.memory_space<vmem>>, %arg5: memref<9x1x128xf32, #tpu.memory_space<vmem>>, %arg6: memref<1x128xf32, #tpu.memory_space<vmem>>, %arg7: memref<128x128xbf16, #tpu.memory_space<vmem>>, %arg8: memref<1x128xf32, #tpu.memory_space<vmem>>, %arg9: memref<1x16x128xf32, #tpu.memory_space<vmem>>) attributes {dimension_semantics = [#tpu.dimension_semantics<parallel>], iteration_bounds = array<i64: 2>, scalar_prefetch = 0 : i64, scratch_operands = 0 : i64, tpu.core_type = #tpu.core_type<tc>, window_params = [{transform_indices = @transform_0, window_bounds = array<i64: 1, 64, 64>}, {pipeline_mode = #tpu.pipeline_mode<synchronous>, transform_indices = @transform_1, window_bounds = array<i64: 64, 128>}, {pipeline_mode = #tpu.pipeline_mode<synchronous>, transform_indices = @transform_2, window_bounds = array<i64: 1, 128>}, {pipeline_mode = #tpu.pipeline_mode<synchronous>, transform_indices = @transform_3, window_bounds = array<i64: 144, 64>}, {pipeline_mode = #tpu.pipeline_mode<synchronous>, transform_indices = @transform_4, window_bounds = array<i64: 9, 1, 128>}, {pipeline_mode = #tpu.pipeline_mode<synchronous>, transform_indices = @transform_5, window_bounds = array<i64: 1, 128>}, {pipeline_mode = #tpu.pipeline_mode<synchronous>, transform_indices = @transform_6, window_bounds = array<i64: 128, 128>}, {pipeline_mode = #tpu.pipeline_mode<synchronous>, transform_indices = @transform_7, window_bounds = array<i64: 1, 128>}, {transform_indices = @transform_8, window_bounds = array<i64: 1, 16, 128>}]} {
    %c0 = arith.constant 0 : index
    %c0_0 = arith.constant 0 : index
    %c0_1 = arith.constant 0 : index
    %0 = vector.load %arg1[%c0, %c0_0, %c0_1] : memref<1x64x64xbf16, #tpu.memory_space<vmem>>, vector<1x64x64xbf16>
    %1 = vector.shape_cast %0 : vector<1x64x64xbf16> to vector<64x64xbf16>
    %c0_2 = arith.constant 0 : index
    %c0_3 = arith.constant 0 : index
    %2 = vector.load %arg2[%c0_2, %c0_3] : memref<64x128xbf16, #tpu.memory_space<vmem>>, vector<64x128xbf16>
    %cst = arith.constant dense<0.000000e+00> : vector<64x128xf32>
    %3 = tpu.matmul %1, %2, %cst {dimension_numbers = #tpu.dot_dimension_numbers<[1], [0], [0], [1], [0, 0, 1, 1], [], []>} : vector<64x64xbf16>, vector<64x128xbf16>, vector<64x128xf32> -> vector<64x128xf32>
    %c0_4 = arith.constant 0 : index
    %c0_5 = arith.constant 0 : index
    %4 = vector.load %arg3[%c0_4, %c0_5] : memref<1x128xf32, #tpu.memory_space<vmem>>, vector<1x128xf32>
    %5 = vector.broadcast %4 : vector<1x128xf32> to vector<64x128xf32>
    %6 = arith.addf %3, %5 : vector<64x128xf32>
    %7 = arith.mulf %6, %6 : vector<64x128xf32>
    %8 = arith.mulf %6, %7 : vector<64x128xf32>
    %cst_6 = arith.constant 4.471500e-02 : f32
    %9 = vector.broadcast %cst_6 : f32 to vector<64x128xf32>
    %10 = arith.mulf %9, %8 : vector<64x128xf32>
    %11 = arith.addf %6, %10 : vector<64x128xf32>
    %cst_7 = arith.constant 0.797884583 : f32
    %12 = vector.broadcast %cst_7 : f32 to vector<64x128xf32>
    %13 = arith.mulf %12, %11 : vector<64x128xf32>
    %14 = math.tanh %13 : vector<64x128xf32>
    %cst_8 = arith.constant 1.000000e+00 : f32
    %15 = vector.broadcast %cst_8 : f32 to vector<64x128xf32>
    %16 = arith.addf %15, %14 : vector<64x128xf32>
    %cst_9 = arith.constant 5.000000e-01 : f32
    %17 = vector.broadcast %cst_9 : f32 to vector<64x128xf32>
    %18 = arith.mulf %17, %16 : vector<64x128xf32>
    %19 = arith.mulf %6, %18 : vector<64x128xf32>
    %c0_10 = arith.constant 0 : index
    %c0_11 = arith.constant 0 : index
    %20 = vector.load %arg4[%c0_10, %c0_11] : memref<144x64xbf16, #tpu.memory_space<vmem>>, vector<144x64xbf16>
    %21 = arith.truncf %19 : vector<64x128xf32> to vector<64x128xbf16>
    %cst_12 = arith.constant dense<0.000000e+00> : vector<144x128xf32>
    %22 = tpu.matmul %20, %21, %cst_12 {dimension_numbers = #tpu.dot_dimension_numbers<[1], [0], [0], [1], [0, 0, 1, 1], [], []>} : vector<144x64xbf16>, vector<64x128xbf16>, vector<144x128xf32> -> vector<144x128xf32>
    %23 = vector.shape_cast %22 : vector<144x128xf32> to vector<9x16x128xf32>
    %c0_13 = arith.constant 0 : index
    %c0_14 = arith.constant 0 : index
    %c0_15 = arith.constant 0 : index
    %24 = vector.load %arg5[%c0_13, %c0_14, %c0_15] : memref<9x1x128xf32, #tpu.memory_space<vmem>>, vector<9x1x128xf32>
    %25 = vector.broadcast %24 : vector<9x1x128xf32> to vector<9x16x128xf32>
    %26 = arith.mulf %23, %25 : vector<9x16x128xf32>
    %cst_16 = arith.constant dense<0.000000e+00> : vector<16x128xf32>
    %27 = vector.multi_reduction <add>, %26, %cst_16 [0] : vector<9x16x128xf32> to vector<16x128xf32>
    %c0_17 = arith.constant 0 : index
    %c0_18 = arith.constant 0 : index
    %28 = vector.load %arg6[%c0_17, %c0_18] : memref<1x128xf32, #tpu.memory_space<vmem>>, vector<1x128xf32>
    %29 = vector.broadcast %28 : vector<1x128xf32> to vector<16x128xf32>
    %30 = arith.addf %27, %29 : vector<16x128xf32>
    %31 = arith.mulf %30, %30 : vector<16x128xf32>
    %32 = arith.mulf %30, %31 : vector<16x128xf32>
    %cst_19 = arith.constant 4.471500e-02 : f32
    %33 = vector.broadcast %cst_19 : f32 to vector<16x128xf32>
    %34 = arith.mulf %33, %32 : vector<16x128xf32>
    %35 = arith.addf %30, %34 : vector<16x128xf32>
    %cst_20 = arith.constant 0.797884583 : f32
    %36 = vector.broadcast %cst_20 : f32 to vector<16x128xf32>
    %37 = arith.mulf %36, %35 : vector<16x128xf32>
    %38 = math.tanh %37 : vector<16x128xf32>
    %cst_21 = arith.constant 1.000000e+00 : f32
    %39 = vector.broadcast %cst_21 : f32 to vector<16x128xf32>
    %40 = arith.addf %39, %38 : vector<16x128xf32>
    %cst_22 = arith.constant 5.000000e-01 : f32
    %41 = vector.broadcast %cst_22 : f32 to vector<16x128xf32>
    %42 = arith.mulf %41, %40 : vector<16x128xf32>
    %43 = arith.mulf %30, %42 : vector<16x128xf32>
    %44 = arith.truncf %43 : vector<16x128xf32> to vector<16x128xbf16>
    %c0_23 = arith.constant 0 : index
    %c0_24 = arith.constant 0 : index
    %45 = vector.load %arg7[%c0_23, %c0_24] : memref<128x128xbf16, #tpu.memory_space<vmem>>, vector<128x128xbf16>
    %cst_25 = arith.constant dense<0.000000e+00> : vector<16x128xf32>
    %46 = tpu.matmul %44, %45, %cst_25 {dimension_numbers = #tpu.dot_dimension_numbers<[1], [0], [0], [1], [0, 0, 1, 1], [], []>} : vector<16x128xbf16>, vector<128x128xbf16>, vector<16x128xf32> -> vector<16x128xf32>
    %c0_26 = arith.constant 0 : index
    %c0_27 = arith.constant 0 : index
    %47 = vector.load %arg8[%c0_26, %c0_27] : memref<1x128xf32, #tpu.memory_space<vmem>>, vector<1x128xf32>
    %48 = vector.broadcast %47 : vector<1x128xf32> to vector<16x128xf32>
    %49 = arith.addf %46, %48 : vector<16x128xf32>
    %c0_28 = arith.constant 0 : index
    %c0_29 = arith.constant 0 : index
    %c0_30 = arith.constant 0 : index
    %50 = vector.load %arg9[%c0_28, %c0_29, %c0_30] : memref<1x16x128xf32, #tpu.memory_space<vmem>>, vector<1x16x128xf32>
    %51 = vector.shape_cast %50 : vector<1x16x128xf32> to vector<16x128xf32>
    %52 = vector.shape_cast %49 : vector<16x128xf32> to vector<1x16x128xf32>
    tpu.vector_store %arg9[%c0_28, %c0_29, %c0_30], %52 {strides = array<i32>} : memref<1x16x128xf32, #tpu.memory_space<vmem>>, vector<1x16x128xf32>,
    return
  }
  func.func @transform_0(%arg0: i32) -> (i32, i32, i32) {
    %c0_i32 = arith.constant 0 : i32
    %c0_i32_0 = arith.constant 0 : i32
    %c0_i32_1 = arith.constant 0 : i32
    return %arg0, %c0_i32, %c0_i32_0 : i32, i32, i32
  }
  func.func @transform_1(%arg0: i32) -> (i32, i32) {
    %c0_i32 = arith.constant 0 : i32
    %c0_i32_0 = arith.constant 0 : i32
    %c0_i32_1 = arith.constant 0 : i32
    return %c0_i32, %c0_i32_0 : i32, i32
  }
  func.func @transform_2(%arg0: i32) -> (i32, i32) {
    %c0_i32 = arith.constant 0 : i32
    %c0_i32_0 = arith.constant 0 : i32
    %c0_i32_1 = arith.constant 0 : i32
    return %c0_i32, %c0_i32_0 : i32, i32
  }
  func.func @transform_3(%arg0: i32) -> (i32, i32) {
    %c0_i32 = arith.constant 0 : i32
    %c0_i32_0 = arith.constant 0 : i32
    %c0_i32_1 = arith.constant 0 : i32
    return %c0_i32, %c0_i32_0 : i32, i32
  }
  func.func @transform_4(%arg0: i32) -> (i32, i32, i32) {
    %c0_i32 = arith.constant 0 : i32
    %c0_i32_0 = arith.constant 0 : i32
    %c0_i32_1 = arith.constant 0 : i32
    %c0_i32_2 = arith.constant 0 : i32
    return %c0_i32, %c0_i32_0, %c0_i32_1 : i32, i32, i32
  }
  func.func @transform_5(%arg0: i32) -> (i32, i32) {
    %c0_i32 = arith.constant 0 : i32
    %c0_i32_0 = arith.constant 0 : i32
    %c0_i32_1 = arith.constant 0 : i32
    return %c0_i32, %c0_i32_0 : i32, i32
  }
  func.func @transform_6(%arg0: i32) -> (i32, i32) {
    %c0_i32 = arith.constant 0 : i32
    %c0_i32_0 = arith.constant 0 : i32
    %c0_i32_1 = arith.constant 0 : i32
    return %c0_i32, %c0_i32_0 : i32, i32
  }
  func.func @transform_7(%arg0: i32) -> (i32, i32) {
    %c0_i32 = arith.constant 0 : i32
    %c0_i32_0 = arith.constant 0 : i32
    %c0_i32_1 = arith.constant 0 : i32
    return %c0_i32, %c0_i32_0 : i32, i32
  }
  func.func @transform_8(%arg0: i32) -> (i32, i32, i32) {
    %c0_i32 = arith.constant 0 : i32
    %c0_i32_0 = arith.constant 0 : i32
    %c0_i32_1 = arith.constant 0 : i32
    return %arg0, %c0_i32, %c0_i32_0 : i32, i32, i32
  }
}

</mosaic_0001>

<bundles_post_ra>
// kernel: tpu_custom_call.1
= control target key start
LH: loop header
LB: loop body
LE: loop exit
PB: predicated region body
PF: predicated region fallthrough
CT: control target
= control target key end

     0   :  { %13 = vsyncpa [#allocation3], 0  ;;  %s1779_s0 = inlined_call_operand.vmem [shape: bf16[2,64,64], index: 0, kind: input, shape index: {}]   ;;  %s1780_s1 = inlined_call_operand.hbm [shape: bf16[64,128], index: 1, kind: input, shape index: {}]   ;;  %s1781_s2 = inlined_call_operand.vmem [shape: f32[1,128], index: 2, kind: input, shape index: {}]   ;;  %s1782_s3 = inlined_call_operand.vmem [shape: bf16[144,64], index: 3, kind: input, shape index: {}]   ;;  %s1783_s4 = inlined_call_operand.vmem [shape: f32[9,1,128], index: 4, kind: input, shape index: {}]   ;;  %s1784_s5 = inlined_call_operand.vmem [shape: f32[1,128], index: 5, kind: input, shape index: {}]   ;;  %s1785_s6 = inlined_call_operand.vmem [shape: bf16[128,128], index: 6, kind: input, shape index: {}]   ;;  %s1786_s7 = inlined_call_operand.vmem [shape: f32[1,128], index: 7, kind: input, shape index: {}]   ;;  %s1787_s8 = inlined_call_operand.hbm [shape: f32[2,16,128], index: 8, kind: output, shape index: {}]  }
   0x1   :  { %14 = vsyncpa [#allocation4], 0 }
   0x2   :  { %16 = vsyncpa [#allocation4 + $0x1], 0  ;;  %s1485_s27 = smov 0   ;;  %s1487_s28 = smov 0  }
   0x3   :  { %s1489_s29 = smov 0   ;;  %s1491_s30 = smov 0  }
   0x4 LB: > { %s1506_s9 = sadd.s32 4294967295, %s1430_s30   ;;  %s1063_s10 = sadd.s32 4294967294, %s1430_s30   ;;  %s1430_s30 = sphi %s1491_s30, %s1795_s30   ;;  %s1426_s29 = sphi %s1489_s29, %s1794_s29   ;;  %s1422_s28 = sphi %s1487_s28, %s1793_s28   ;;  %s1418_s27 = sphi %s1485_s27, %s1792_s27  }
   0x5   : > { %s1510_s11 = sadd.s32 1, %s1430_s30   ;;  %s202_s12 = sadd.s32 1, %s1426_s29 }
   0x6   : > { %s199_s13 = ssub.s32 %s1430_s30, %s1510_s11  ;;  %p212_p0 = scmp.ne.s32.totalorder %s1426_s29, %s1422_s28 }
   0x7   : > { %p200_p1 = scmp.eq.s32.totalorder %s199_s13, 0  ;;  %p213_p2 = scmp.eq.s32.totalorder %s1506_s9, 1 }
   0x8   : > { %p218_p3 = scmp.ne.s32.totalorder %s1422_s28, %s1418_s27  ;;  %p219_p4 = scmp.eq.s32.totalorder %s1063_s10, 1 }
   0x9   : > { %s1521_s14 = scalar_select %p200_p1, %s1426_s29, %s202_s12  }
   0xa   : > { %p1523_p5 = por %p213_p2, %p212_p0  ;;  %p1527_p6 = por %p219_p4, %p218_p3 }
   0xb   : > { %p1064_p7 = scmp.ge.s32.totalorder %s1430_s30, 1  ;;  %p226_p8 = scmp.lt.s32.totalorder %s1430_s30, 3 }
   0xc   : > { %s1789_s16 = scalar_select %p1527_p6, 1, 0 }
   0xd   : > { %p1253_p9 = scmp.eq.s32.totalorder %s1506_s9, 0  ;;  %p1534_p10 = pnand %p1064_p7, %p226_p8 }
   0xe   : > { %s1432_s18 = smov [#allocation2]  }
   0xf   : > { %s238_s19 = sshll.u32 %s1432_s18, 4  ;;  %p1245_p11 = pneg %p1534_p10  ;;  %s239_s19 = int_to_ptr.vmem [resolvable:$true] %s238_s19 }
  0x10   : > { %s1351_s20 = scalar_lea.vmem %s239_s19, 512  ;;  %p1359_p3 = scmp.lt.s32.totalorder %s239_s19, %s239_s19 }
  0x11   : > { %p1246_p12 = pnand %p1253_p9, %p1245_p11  ;;  %p1352_p0 = scmp.ne.s32.totalorder %s239_s19, %s1351_s20 }
  0x12   : > { %p1360_p4 = scmp.lt.s32.totalorder %s1351_s20, %s1351_s20 }
  0x13   : > { %p1342_p13 = pneg %p1246_p12 }
  0x14   : > { %p1361_p6 = por %p1360_p4, %p1359_p3 }
  0x15   : > { %p1354_p1 = pnand %p1352_p0, %p1342_p13 }
  0x17   : > { %p1355_p2 = pneg %p1354_p1 }
  0x19   : > { %p1362_p7 = pnand %p1361_p6, %p1355_p2 }
  0x1b   : > { %1365 = shalt.err (!%p1362_p7)
}
  0x1c   : > { %s1433_s21 = smov 64   ;;  %s1434_s22 = smov 4  }
  0x1d   : > { %1248 = dma.hbm_to_vmem [thread:$0]  (!%p1246_p12), %s1780_s1, 512, %s239_s19, [#allocation3], %s1433_s21, %s1433_s21, %s1434_s22  }
  0x1e   : > { %280 = sbr.rel (%p1534_p10) target bundleno = 819 (0x333), region = 52 }
  0x23   : > { %1409 = dma.done.wait (%p1253_p9), [#allocation3], 512  }
  0x24   : > { %1411 = vsyncadd (%p1253_p9), [#allocation3], 4294966784  ;;  %p314_p8 = scmp.lt.s32.totalorder %s1506_s9, 1  ;;  %v1295_v0 = vld [vmem:[#allocation2 + $0x18] sm:$0xff]   ;;  %v1296_v1 = vld [vmem:[#allocation2 + $0x10] sm:$0xff]   ;;  %vm387_vm0 = vcmask 523264  }
  0x25   : > { %1159 = vmatprep.subr.bf16.mxu0 %v1295_v0  ;;  %v1297_v2 = vld [vmem:[#allocation2 + $0x8] sm:$0xff]   ;;  %v1298_v4 = vld [vmem:[#allocation2] sm:$0xff]   ;;  %v1435_v8 = vmov 0.0   ;;  %vm1436_vm1 = vmmov 0   ;;  %s311_s21 = sand.u32 1, %s1422_s28   ;;  %s1128_s10 = sshll.u32 %s1506_s9, 8 }
  0x26   : > { %s315_s25 = scalar_select %p314_p8, %s1506_s9, 1  ;;  %1160 = vmatpush3.bf16.msra.mxu0 %v1295_v0  ;;  %1175 = vmatprep.subr.bf16.mxu1 %v1435_v8  ;;  %v1072_v10 = vld [vmem:[%s1781_s2] ss:$0 sm:$0xff] }
  0x27   : > { %1161 = vmatprep.subr.bf16.mxu0 %v1296_v1  ;;  %1183 = vmatprep.mubr.msk.bf16.mxu1 %vm1436_vm1, %v1435_v8  ;;  %s1069_s22 = sshll.u32 %s311_s21, 4  ;;  %s1737_s17 = scalar_lea.hbm %s1787_s8, %s1128_s10 }
  0x28   : > { %s1127_s26 = sshll.u32 %s315_s25, 5  ;;  %s313_s25 = scalar_lea.vmem [#allocation5], %s1069_s22 }
  0x29   : > { %s318_s13 = scalar_lea.vmem %s1779_s0, %s1127_s26  ;;  %s989_s26 = sshll.u32 %s313_s25, 4  ;;  %s1732_s26 = int_to_ptr.vmem [resolvable:$true] %s989_s26 }
  0x2a   : > { %v1299_v3 = vld [vmem:[%s318_s13] sm:$0xff]   ;;  %1162 = vmatpush3.bf16.msra.mxu0 %v1296_v1  ;;  %v1300_v5 = vld [vmem:[%s318_s13 + $0x8] sm:$0xff]   ;;  %v1301_v6 = vld [vmem:[%s318_s13 + $0x10] sm:$0xff]   ;;  %s1739_s18 = scalar_lea.sflag [#allocation4], %s311_s21  ;;  %s1366_s19 = scalar_lea.vmem %s1732_s26, 256 }
  0x2b   : > { %1167 = vmatprep.mubr.msk.bf16.mxu0 %vm387_vm0, %v1299_v3  ;;  %1163 = vmatprep.subr.bf16.mxu0 %v1297_v2  ;;  %v1302_v7 = vld [vmem:[%s318_s13 + $0x18] sm:$0xff]   ;;  %p1367_p6 = scmp.ne.s32.totalorder %s1732_s26, %s1366_s19  ;;  %s1437_s9 = smov [#allocation5]  }
  0x2c   : > { %s1370_s20 = sshll.u32 %s1437_s9, 4  ;;  %s1371_s20 = int_to_ptr.vmem [resolvable:$false] %s1370_s20 }
  0x2d   : > { %p1368_p9 = pnand %p1367_p6, %p1523_p5  ;;  %s1372_s22 = scalar_lea.vmem %s1371_s20, 512 }
  0x2e   : > { %1164 = vmatpush3.bf16.msra.mxu0 %v1297_v2  ;;  %p1373_p11 = scmp.lt.s32.totalorder %s1732_s26, %s1371_s20  ;;  %p1374_p12 = scmp.lt.s32.totalorder %s1372_s22, %s1366_s19 }
  0x2f   : > { %1165 = vmatprep.subr.bf16.mxu0 %v1298_v4  ;;  %p1369_p10 = pneg %p1368_p9 }
  0x30   : > { %p1375_p13 = por %p1374_p12, %p1373_p11 }
  0x32   : > { %1166 = vmatpush3.bf16.msra.mxu0 %v1298_v4  ;;  %p1376_p0 = pnand %p1375_p13, %p1369_p10 }
  0x33   : > { %1219 = vmatprep.subr.bf16.mxu0 %v1435_v8 }
  0x35   : > { %1168 = vmatmul.mubr.msk.bf16.vlgmr.msra.gmra.mxu0 %vm387_vm0, %v1300_v5 }
  0x36   : > { %1171 = vmatprep.mubr.msk.bf16.mxu0 %vm387_vm0, %v1301_v6 }
  0x3d   : > { %1172 = vmatmul.mubr.msk.bf16.gmra.mxu0 %vm387_vm0, %v1302_v7 }
  0x3e   : > { %1235 = vmatprep.mubr.msk.bf16.mxu0 %vm1436_vm1, %v1435_v8 }
  0xf5   : > { %v1169_v9 = vpop.f32.mrf.mxu0 }
  0xf6   : > { %v1569_v12 = vadd.f32 %v1169_v9, %v1072_v10 }
  0xf7   : > { %v434_v11 = vpop.f32.mrf.mxu0 }
  0xf8   : > { %v467_v16 = vmul.f32 %v1569_v12, %v1569_v12  ;;  %v1579_v19 = vadd.f32 %v1072_v10, %v434_v11 }
  0xf9   : > { %v1170_v13 = vpop.f32.mrf.mxu0 }
  0xfa   : > { %v1571_v14 = vadd.f32 %v1170_v13, %v1072_v10  ;;  %v475_v25 = vmul.f32 %v467_v16, %v1569_v12  ;;  %v465_v26 = vmul.f32 %v1579_v19, %v1579_v19 }
  0xfb   : > { %v437_v15 = vpop.f32.mrf.mxu0 }
  0xfc   : > { %v468_v17 = vmul.f32 %v1571_v14, %v1571_v14  ;;  %v1577_v18 = vadd.f32 %v1072_v10, %v437_v15  ;;  %v483_v36 = vmul.f32 0.044715, %v475_v25  ;;  %v473_v38 = vmul.f32 %v465_v26, %v1579_v19 }
  0xfd   : > { %v1173_v20 = vpop.f32.mrf.mxu0 }
  0xfe   : > { %v476_v21 = vmul.f32 %v468_v17, %v1571_v14  ;;  %v466_v22 = vmul.f32 %v1577_v18, %v1577_v18  ;;  %v1584_v23 = vadd.f32 %v1173_v20, %v1072_v10  ;;  %v491_v48 = vadd.f32 %v483_v36, %v1569_v12 }
  0xff   : > { %v450_v24 = vpop.f32.mrf.mxu0  ;;  %v481_v50 = vmul.f32 0.044715, %v473_v38 }
 0x100   : > { %v471_v27 = vmul.f32 %v1584_v23, %v1584_v23  ;;  %v1591_v28 = vadd.f32 %v1072_v10, %v450_v24  ;;  %v484_v30 = vmul.f32 0.044715, %v476_v21  ;;  %v474_v31 = vmul.f32 %v466_v22, %v1577_v18 }
 0x101   : > { %v1174_v29 = vpop.f32.mrf.mxu0  ;;  %v499_v60 = vmul.f32 0.7978846, %v491_v48  ;;  %v489_v61 = vadd.f32 %v481_v50, %v1579_v19  ;;  %v1312_v48 = vld [vmem:[%s1785_s6 + $0x38] sm:$0xff]   ;;  %v1314_v50 = vld [vmem:[%s1785_s6 + $0x28] sm:$0xff]  }
 0x102   : > { %v479_v32 = vmul.f32 %v471_v27, %v1584_v23  ;;  %v469_v33 = vmul.f32 %v1591_v28, %v1591_v28  ;;  %v462_v34 = vadd.f32 %v1174_v29, %v1072_v10  ;;  %v492_v42 = vadd.f32 %v484_v30, %v1571_v14  ;;  %1220 = vmatpush3.bf16.msra.mxu0 %v1312_v48 }
 0x103   : > { %v453_v35 = vpop.f32.mrf.mxu0  ;;  %v482_v44 = vmul.f32 0.044715, %v474_v31  ;;  %v497_v1 = vmul.f32 0.7978846, %v489_v61  ;;  %1221 = vmatprep.subr.bf16.mxu0 %v1435_v8 }
 0x104   : > { %v454_v37 = vadd.f32 %v1072_v10, %v453_v35  ;;  %v487_v39 = vmul.f32 0.044715, %v479_v32  ;;  %v477_v40 = vmul.f32 %v469_v33, %v1591_v28  ;;  %v472_v41 = vmul.f32 %v462_v34, %v462_v34 }
 0x105   : > { %v500_v54 = vmul.f32 0.7978846, %v492_v42  ;;  %v490_v56 = vadd.f32 %v482_v44, %v1577_v18  ;;  %v1308_v44 = vld [vmem:[%s1782_s3 + $0x28] sm:$0xff]  }
 0x106   : > { %v470_v43 = vmul.f32 %v454_v37, %v454_v37  ;;  %v495_v45 = vadd.f32 %v487_v39, %v1584_v23  ;;  %v485_v46 = vmul.f32 0.044715, %v477_v40  ;;  %v480_v47 = vmul.f32 %v472_v41, %v462_v34 }
 0x107   : > { %v498_v0 = vmul.f32 0.7978846, %v490_v56 }
 0x108   : > { %v478_v49 = vmul.f32 %v470_v43, %v454_v37  ;;  %v503_v51 = vmul.f32 0.7978846, %v495_v45  ;;  %v493_v52 = vadd.f32 %v485_v46, %v1591_v28  ;;  %v488_v53 = vmul.f32 0.044715, %v480_v47  ;;  %v1307_v43 = vld [vmem:[%s1782_s3 + $0x20] sm:$0xff]   ;;  %v1309_v45 = vld [vmem:[%s1782_s3 + $0x30] sm:$0xff]  }
 0x109   : > { %v1310_v46 = vld [vmem:[%s1782_s3 + $0x38] sm:$0xff]   ;;  %v1311_v47 = vld [vmem:[%s1782_s3 + $0x40] sm:$0xff]  }
 0x10a   : > { %v486_v55 = vmul.f32 0.044715, %v478_v49  ;;  %v501_v57 = vmul.f32 0.7978846, %v493_v52  ;;  %v496_v58 = vadd.f32 %v488_v53, %v462_v34  ;;  %1320 = vtanh.f32 %v503_v51  ;;  %v1313_v49 = vld [vmem:[%s1785_s6 + $0x30] sm:$0xff]   ;;  %v1315_v51 = vld [vmem:[%s1785_s6 + $0x20] sm:$0xff]  }
 0x10b   : > { %1222 = vmatpush3.bf16.msra.mxu0 %v1313_v49  ;;  %v1316_v52 = vld [vmem:[%s1785_s6 + $0x18] sm:$0xff]   ;;  %v1317_v53 = vld [vmem:[%s1785_s6 + $0x10] sm:$0xff]  }
 0x10c   : > { %v494_v59 = vadd.f32 %v486_v55, %v454_v37  ;;  %1322 = vtanh.f32 %v501_v57  ;;  %v504_v62 = vmul.f32 0.7978846, %v496_v58  ;;  %1223 = vmatprep.subr.bf16.mxu0 %v1435_v8  ;;  %v1319_v55 = vld [vmem:[%s1785_s6] sm:$0xff]  }
 0x10d   : > { %1324 = vtanh.f32 %v500_v54  ;;  %v1318_v54 = vld [vmem:[%s1785_s6 + $0x8] sm:$0xff]  }
 0x10e   : > { %v502_v63 = vmul.f32 0.7978846, %v494_v59  ;;  %1326 = vtanh.f32 %v504_v62 }
 0x10f   : > { %1224 = vmatpush3.bf16.msra.mxu0 %v1314_v50 }
 0x110   : > { %1328 = vtanh.f32 %v502_v63  ;;  %1225 = vmatprep.subr.bf16.mxu0 %v1435_v8 }
 0x111   : > { %1330 = vtanh.f32 %v499_v60 }
 0x112   : > { %1332 = vtanh.f32 %v498_v0 }
 0x113   : > { %1334 = vtanh.f32 %v497_v1  ;;  %1226 = vmatpush3.bf16.msra.mxu0 %v1315_v51 }
 0x114   : > { %1227 = vmatprep.subr.bf16.mxu0 %v1435_v8 }
 0x117   : > { %v1321_v2 = vpop.eup %1320  ;;  %1228 = vmatpush3.bf16.msra.mxu0 %v1316_v52 }
 0x118   : > { %v519_v3 = vadd.f32 1.0, %v1321_v2  ;;  %1229 = vmatprep.subr.bf16.mxu0 %v1435_v8 }
 0x119   : > { %v1323_v4 = vpop.eup %1322 }
 0x11a   : > { %v1325_v5 = vpop.eup %1324  ;;  %v527_v10 = vmul.f32 0.5, %v519_v3  ;;  %v517_v11 = vadd.f32 1.0, %v1323_v4 }
 0x11b   : > { %v1327_v6 = vpop.eup %1326  ;;  %v516_v17 = vadd.f32 1.0, %v1325_v5  ;;  %1230 = vmatpush3.bf16.msra.mxu0 %v1317_v53 }
 0x11c   : > { %v520_v9 = vadd.f32 1.0, %v1327_v6  ;;  %v535_v22 = vmul.f32 %v527_v10, %v1584_v23  ;;  %v525_v25 = vmul.f32 0.5, %v517_v11  ;;  %1231 = vmatprep.subr.bf16.mxu0 %v1435_v8 }
 0x11d   : > { %v1329_v7 = vpop.eup %1328  ;;  %v524_v31 = vmul.f32 0.5, %v516_v17  ;;  %v1104_v17 = vld [vmem:[%s1783_s4 + $0x1] ss:$0 sm:$0xff] }
 0x11e   : > { %v1331_v13 = vpop.eup %1330  ;;  %v518_v15 = vadd.f32 1.0, %v1329_v7  ;;  %v528_v16 = vmul.f32 0.5, %v520_v9  ;;  %v533_v33 = vmul.f32 %v525_v25, %v1591_v28 }
 0x11f   : > { %v1333_v20 = vpop.eup %1332  ;;  %v515_v26 = vadd.f32 1.0, %v1331_v13  ;;  %v532_v39 = vmul.f32 %v524_v31, %v1571_v14  ;;  %v1303_v14 = vld [vmem:[%s1782_s3] sm:$0xff]   ;;  %1232 = vmatpush3.bf16.msra.mxu0 %v1318_v54  ;;  %v1111_v54 = vld [vmem:[%s1783_s4 + $0x8] ss:$0 sm:$0xff] }
 0x120   : > { %v526_v21 = vmul.f32 0.5, %v518_v15  ;;  %v536_v24 = vmul.f32 %v528_v16, %v462_v34  ;;  %v1335_v27 = vpop.eup %1334  ;;  %v514_v32 = vadd.f32 1.0, %v1333_v20  ;;  %1233 = vmatprep.subr.bf16.mxu0 %v1435_v8  ;;  %v1107_v31 = vld [vmem:[%s1783_s4 + $0x4] ss:$0 sm:$0xff] }
 0x121   : > { %v523_v35 = vmul.f32 0.5, %v515_v26  ;;  %v513_v36 = vadd.f32 1.0, %v1335_v27  ;;  %v1106_v26 = vld [vmem:[%s1783_s4 + $0x3] ss:$0 sm:$0xff] }
 0x122   : > { %v558_v29 = vpack.c.bf16 %v536_v24, %v535_v22  ;;  %v534_v30 = vmul.f32 %v526_v21, %v454_v37  ;;  %v522_v40 = vmul.f32 0.5, %v514_v32  ;;  %v1103_v21 = vld [vmem:[%s1783_s4] ss:$0 sm:$0xff]  ;;  %v1105_v22 = vld [vmem:[%s1783_s4 + $0x2] ss:$0 sm:$0xff] }
 0x123   : > { %v531_v23 = vmul.f32 %v523_v35, %v1569_v12  ;;  %v521_v34 = vmul.f32 0.5, %v513_v36  ;;  %v1304_v12 = vld [vmem:[%s1782_s3 + $0x8] sm:$0xff]   ;;  %1234 = vmatpush3.bf16.msra.mxu0 %v1319_v55 }
 0x124   : > { %1176 = vmatpush3.bf16.msra.mxu1 %v558_v29  ;;  %v557_v38 = vpack.c.bf16 %v534_v30, %v533_v33  ;;  %v530_v41 = vmul.f32 %v522_v40, %v1577_v18  ;;  %v1305_v18 = vld [vmem:[%s1782_s3 + $0x10] sm:$0xff]  }
 0x125   : > { %1177 = vmatprep.subr.bf16.mxu1 %v1435_v8  ;;  %v556_v37 = vpack.c.bf16 %v532_v39, %v531_v23  ;;  %v529_v28 = vmul.f32 %v521_v34, %v1579_v19  ;;  %v1306_v19 = vld [vmem:[%s1782_s3 + $0x18] sm:$0xff]  }
 0x127   : > { %v555_v42 = vpack.c.bf16 %v530_v41, %v529_v28  ;;  %v1109_v41 = vld [vmem:[%s1783_s4 + $0x6] ss:$0 sm:$0xff] }
 0x128   : > { %1178 = vmatpush3.bf16.msra.mxu1 %v557_v38  ;;  %v1108_v38 = vld [vmem:[%s1783_s4 + $0x5] ss:$0 sm:$0xff] }
 0x129   : > { %1179 = vmatprep.subr.bf16.mxu1 %v1435_v8 }
 0x12c   : > { %1180 = vmatpush3.bf16.msra.mxu1 %v556_v37 }
 0x12d   : > { %1181 = vmatprep.subr.bf16.mxu1 %v1435_v8 }
 0x130   : > { %1182 = vmatpush3.bf16.msra.mxu1 %v555_v42 }
 0x133   : > { %1184 = vmatmul.mubr.msk.bf16.vlgmr.msra.gmra.mxu1 %vm387_vm0, %v1303_v14 }
 0x134   : > { %1187 = vmatprep.mubr.msk.bf16.mxu1 %vm1436_vm1, %v1435_v8 }
 0x13b   : > { %1188 = vmatmul.mubr.msk.bf16.gmra.mxu1 %vm387_vm0, %v1304_v12 }
 0x13c   : > { %1191 = vmatprep.mubr.msk.bf16.mxu1 %vm1436_vm1, %v1435_v8 }
 0x143   : > { %1192 = vmatmul.mubr.msk.bf16.gmra.mxu1 %vm387_vm0, %v1305_v18 }
 0x144   : > { %1195 = vmatprep.mubr.msk.bf16.mxu1 %vm1436_vm1, %v1435_v8 }
 0x14b   : > { %1196 = vmatmul.mubr.msk.bf16.gmra.mxu1 %vm387_vm0, %v1306_v19  ;;  %v1110_v19 = vld [vmem:[%s1783_s4 + $0x7] ss:$0 sm:$0xff] }
 0x14c   : > { %1199 = vmatprep.mubr.msk.bf16.mxu1 %vm1436_vm1, %v1435_v8 }
 0x153   : > { %1200 = vmatmul.mubr.msk.bf16.gmra.mxu1 %vm387_vm0, %v1307_v43 }
 0x154   : > { %1203 = vmatprep.mubr.msk.bf16.mxu1 %vm1436_vm1, %v1435_v8 }
 0x15b   : > { %1204 = vmatmul.mubr.msk.bf16.gmra.mxu1 %vm387_vm0, %v1308_v44 }
 0x15c   : > { %1207 = vmatprep.mubr.msk.bf16.mxu1 %vm1436_vm1, %v1435_v8 }
 0x163   : > { %1208 = vmatmul.mubr.msk.bf16.gmra.mxu1 %vm387_vm0, %v1309_v45 }
 0x164   : > { %1211 = vmatprep.mubr.msk.bf16.mxu1 %vm1436_vm1, %v1435_v8 }
 0x16b   : > { %1212 = vmatmul.mubr.msk.bf16.gmra.mxu1 %vm387_vm0, %v1310_v46 }
 0x16c   : > { %1215 = vmatprep.mubr.msk.bf16.mxu1 %vm1436_vm1, %v1435_v8 }
 0x173   : > { %1216 = vmatmul.mubr.msk.bf16.gmra.mxu1 %vm387_vm0, %v1311_v47 }
 0x1f3   : > { %v665_v56 = vpop.f32.mrf.mxu1 }
 0x1f4   : > { %v799_v29 = vmul.f32 %v1103_v21, %v665_v56 }
 0x1f5   : > { %v1185_v57 = vpop.f32.mrf.mxu1 }
 0x1f7   : > { %v668_v58 = vpop.f32.mrf.mxu1 }
 0x1f8   : > { %v800_v40 = vmul.f32 %v1103_v21, %v668_v58 }
 0x1f9   : > { %v1186_v59 = vpop.f32.mrf.mxu1 }
 0x1fb   : > { %v673_v60 = vpop.f32.mrf.mxu1 }
 0x1fc   : > { %v801_v25 = vmul.f32 %v1104_v17, %v673_v60 }
 0x1fd   : > { %v1189_v61 = vpop.f32.mrf.mxu1 }
 0x1fe   : > { %v817_v33 = vadd.f32 %v801_v25, %v799_v29 }
 0x1ff   : > { %v676_v62 = vpop.f32.mrf.mxu1 }
 0x200   : > { %v802_v35 = vmul.f32 %v1104_v17, %v676_v62 }
 0x201   : > { %v1190_v63 = vpop.f32.mrf.mxu1 }
 0x202   : > { %v825_v42 = vadd.f32 %v802_v35, %v800_v40  ;;  %v1112_v63 = vld [vmem:[%s1784_s5] ss:$0 sm:$0xff] }
 0x203   : > { %v681_v0 = vpop.f32.mrf.mxu1 }
 0x204   : > { %v803_v30 = vmul.f32 %v1105_v22, %v681_v0 }
 0x205   : > { %v1193_v1 = vpop.f32.mrf.mxu1 }
 0x206   : > { %v818_v23 = vadd.f32 %v817_v33, %v803_v30 }
 0x207   : > { %v684_v2 = vpop.f32.mrf.mxu1 }
 0x208   : > { %v804_v34 = vmul.f32 %v1105_v22, %v684_v2 }
 0x209   : > { %v1194_v3 = vpop.f32.mrf.mxu1 }
 0x20a   : > { %v826_v44 = vadd.f32 %v825_v42, %v804_v34 }
 0x20b   : > { %v689_v4 = vpop.f32.mrf.mxu1 }
 0x20c   : > { %v805_v36 = vmul.f32 %v1106_v26, %v689_v4 }
 0x20d   : > { %v1197_v5 = vpop.f32.mrf.mxu1 }
 0x20e   : > { %v819_v14 = vadd.f32 %v818_v23, %v805_v36  ;;  %v1113_v36 = vld [vmem:[%s1786_s7] ss:$0 sm:$0xff] }
 0x20f   : > { %v692_v8 = vpop.f32.mrf.mxu1 }
 0x210   : > { %v806_v12 = vmul.f32 %v1106_v26, %v692_v8 }
 0x211   : > { %v1198_v6 = vpop.f32.mrf.mxu1 }
 0x212   : > { %v827_v49 = vadd.f32 %v826_v44, %v806_v12 }
 0x213   : > { %v697_v7 = vpop.f32.mrf.mxu1 }
 0x214   : > { %v807_v37 = vmul.f32 %v1107_v31, %v697_v7 }
 0x215   : > { %v1201_v9 = vpop.f32.mrf.mxu1 }
 0x216   : > { %v820_v45 = vadd.f32 %v819_v14, %v807_v37 }
 0x217   : > { %v700_v10 = vpop.f32.mrf.mxu1 }
 0x218   : > { %v808_v46 = vmul.f32 %v1107_v31, %v700_v10 }
 0x219   : > { %v1202_v11 = vpop.f32.mrf.mxu1 }
 0x21a   : > { %v828_v55 = vadd.f32 %v827_v49, %v808_v46 }
 0x21b   : > { %v705_v13 = vpop.f32.mrf.mxu1 }
 0x21c   : > { %v809_v18 = vmul.f32 %v1108_v38, %v705_v13 }
 0x21d   : > { %v1205_v15 = vpop.f32.mrf.mxu1 }
 0x21e   : > { %v821_v50 = vadd.f32 %v820_v45, %v809_v18 }
 0x21f   : > { %v708_v16 = vpop.f32.mrf.mxu1 }
 0x220   : > { %v810_v51 = vmul.f32 %v1108_v38, %v708_v16 }
 0x221   : > { %v1206_v20 = vpop.f32.mrf.mxu1 }
 0x222   : > { %v829_v59 = vadd.f32 %v828_v55, %v810_v51 }
 0x223   : > { %v713_v24 = vpop.f32.mrf.mxu1 }
 0x224   : > { %v811_v47 = vmul.f32 %v1109_v41, %v713_v24 }
 0x225   : > { %v1209_v27 = vpop.f32.mrf.mxu1 }
 0x226   : > { %v822_v56 = vadd.f32 %v821_v50, %v811_v47 }
 0x227   : > { %v716_v32 = vpop.f32.mrf.mxu1 }
 0x228   : > { %v812_v57 = vmul.f32 %v1109_v41, %v716_v32 }
 0x229   : > { %v1210_v39 = vpop.f32.mrf.mxu1 }
 0x22a   : > { %v830_v1 = vadd.f32 %v829_v59, %v812_v57 }
 0x22b   : > { %v721_v28 = vpop.f32.mrf.mxu1 }
 0x22c   : > { %v813_v52 = vmul.f32 %v1110_v19, %v721_v28 }
 0x22d   : > { %v1213_v43 = vpop.f32.mrf.mxu1 }
 0x22e   : > { %v823_v60 = vadd.f32 %v822_v56, %v813_v52 }
 0x22f   : > { %v724_v48 = vpop.f32.mrf.mxu1 }
 0x230   : > { %v814_v61 = vmul.f32 %v1110_v19, %v724_v48 }
 0x231   : > { %v1214_v53 = vpop.f32.mrf.mxu1 }
 0x232   : > { %v831_v4 = vadd.f32 %v830_v1, %v814_v61 }
 0x233   : > { %v729_v58 = vpop.f32.mrf.mxu1 }
 0x234   : > { %v815_v62 = vmul.f32 %v1111_v54, %v729_v58 }
 0x235   : > { %v1217_v0 = vpop.f32.mrf.mxu1 }
 0x236   : > { %v824_v2 = vadd.f32 %v823_v60, %v815_v62 }
 0x237   : > { %v732_v3 = vpop.f32.mrf.mxu1 }
 0x238   : > { %v840_v5 = vadd.f32 %v1112_v63, %v824_v2  ;;  %v816_v8 = vmul.f32 %v1111_v54, %v732_v3 }
 0x239   : > { %v1218_v6 = vpop.f32.mrf.mxu1 }
 0x23a   : > { %v842_v7 = vmul.f32 %v840_v5, %v840_v5  ;;  %v832_v9 = vadd.f32 %v831_v4, %v816_v8 }
 0x23c   : > { %v844_v10 = vmul.f32 %v842_v7, %v840_v5  ;;  %v841_v11 = vadd.f32 %v1112_v63, %v832_v9 }
 0x23e   : > { %v846_v13 = vmul.f32 0.044715, %v844_v10  ;;  %v843_v15 = vmul.f32 %v841_v11, %v841_v11 }
 0x240   : > { %v848_v16 = vadd.f32 %v846_v13, %v840_v5  ;;  %v845_v17 = vmul.f32 %v843_v15, %v841_v11 }
 0x242   : > { %v850_v20 = vmul.f32 0.7978846, %v848_v16  ;;  %v847_v21 = vmul.f32 0.044715, %v845_v17 }
 0x244   : > { %1336 = vtanh.f32 %v850_v20  ;;  %v849_v22 = vadd.f32 %v847_v21, %v841_v11 }
 0x246   : > { %v851_v24 = vmul.f32 0.7978846, %v849_v22 }
 0x248   : > { %1338 = vtanh.f32 %v851_v24 }
 0x251   : > { %v1337_v25 = vpop.eup %1336 }
 0x252   : > { %v854_v26 = vadd.f32 1.0, %v1337_v25 }
 0x254   : > { %v856_v29 = vmul.f32 0.5, %v854_v26 }
 0x255   : > { %v1339_v27 = vpop.eup %1338 }
 0x256   : > { %v855_v30 = vadd.f32 1.0, %v1339_v27  ;;  %v858_v32 = vmul.f32 %v856_v29, %v840_v5 }
 0x258   : > { %v857_v31 = vmul.f32 0.5, %v855_v30 }
 0x25a   : > { %v859_v33 = vmul.f32 %v857_v31, %v841_v11 }
 0x25c   : > { %v860_v35 = vpack.c.bf16 %v859_v33, %v858_v32 }
 0x25e   : > { %1236 = vmatmul.mubr.bf16.vlgmr.msra.gmra.mxu0 %v860_v35 }
 0x31e   : > { %v966_v38 = vpop.f32.mrf.mxu0 }
 0x31f   : > { %v967_v39 = vadd.f32 %v1113_v36, %v966_v38 }
 0x320   : > { %v1237_v40 = vpop.f32.mrf.mxu0 }
 0x321   : > { %973 = vst [vmem:[%s313_s25] sm:$0xff] %v967_v39 }
 0x322   : > { %v969_v23 = vpop.f32.mrf.mxu0 }
 0x323   : > { %v970_v34 = vadd.f32 %v1113_v36, %v969_v23 }
 0x324   : > { %v1238_v37 = vpop.f32.mrf.mxu0 }
 0x325   : > { %974 = vst [vmem:[%s313_s25 + $0x8] sm:$0xff] %v970_v34 }
 0x326   : > { %1379 = shalt.err (!%p1376_p0)
}
 0x327   : > { %s1380_s21 = scalar_lea.hbm %s1737_s17, 256  ;;  %s1384_s25 = scalar_lea.hbm %s1787_s8, 512 }
 0x328   : > { %p1381_p1 = scmp.ne.s32.totalorder %s1737_s17, %s1380_s21  ;;  %p1385_p4 = scmp.lt.s32.totalorder %s1737_s17, %s1787_s8 }
 0x329   : > { %p1386_p7 = scmp.lt.s32.totalorder %s1384_s25, %s1380_s21 }
 0x32a   : > { %p1382_p2 = pnand %p1381_p1, %p1523_p5 }
 0x32b   : > { %p1387_p8 = por %p1386_p7, %p1385_p4 }
 0x32c   : > { %p1383_p3 = pneg %p1382_p2 }
 0x32e   : > { %p1388_p6 = pnand %p1387_p8, %p1383_p3 }
 0x330   : > { %1391 = shalt.err (!%p1388_p6)
}
 0x331   : > { %s1438_s13 = smov 128   ;;  %s1439_s19 = smov 8  }
 0x332   : > { %1243 = dma.vmem_to_hbm [thread:$0]  (%p1523_p5), %s1732_s26, 256, %s1737_s17, %s1739_s18, %s1438_s13, %s1438_s13, %s1439_s19  }
 0x333 PF: > { %p1255_p9 = scmp.ge.s32.totalorder %s1430_s30, 2  ;;  %s1004_s9 = sand.u32 1, %s1418_s27  }
 0x334   : > { %p1791_p10 = scmp.ne.s32.totalorder %s1789_s16, 0  ;;  %s1005_s20 = scalar_lea.sflag [#allocation4], %s1004_s9 }
 0x336   : > { %p1250_p11 = pnand %p1255_p9, %p1791_p10 }
 0x338   : > { %p1251_p12 = pneg %p1250_p11 }
 0x33a   : > { %1413 = dma.done.wait (%p1251_p12), %s1005_s20, 256  }
 0x33b   : > { %1415 = vsyncadd (%p1251_p12), %s1005_s20, 4294967040  ;;  %p19_p13 = scmp.ge.s32.totalorder %s1510_s11, 4   ;;  %s1792_s27 = smov %s1422_s28 }
 0x33c   : > { %s1793_s28 = smov %s1426_s29  ;;  %s1794_s29 = smov %s1521_s14 }
 0x33d   : > { %s1795_s30 = smov %s1510_s11  ;;  %21 = sbr.rel (!%p19_p13) target bundleno = 4 (0x4), region = 92 }
 0x342   :  { %1010 = vsyncpa [#allocation3], 1 }
 0x343   :  { %1012 = vsyncpa [#allocation3 + $0x1], 1 }
 0x344   :  { %1013 = vsyncpa [#allocation4], 1 }
 0x345   :  { %1015 = vsyncpa [#allocation4 + $0x1], 1 }

</bundles_post_ra>
